<compile_context>
chip_gen: v5e
topology: v5e:2x2
jax: 0.10.0
libtpu: 0.0.40
codegen_flags: <defaults>
</compile_context>

<pallas_src>
import functools

import jax
import jax.numpy as jnp
from jax.experimental import pallas as pl
from jax.experimental.pallas import tpu as pltpu


def _layernorm_kernel(x_ref, gamma_ref, beta_ref, o_ref, *, eps, n):
    # x_ref, o_ref: (tb, N) lane-dense blocks.  gamma_ref, beta_ref: (1, N).
    inv_n = 1.0 / n
    inv_nm1 = 1.0 / max(n - 1, 1)  # torch .std(): unbiased (Bessel, n-1)

    # --- pass 1: per-row mean (f32 accumulation; cast fuses into the sweep) ---
    s1 = jnp.sum(x_ref[...].astype(jnp.float32), axis=-1, keepdims=True)   # (tb, 1)
    mean = s1 * inv_n

    # --- pass 2: centered sum of squares (two-pass -> no cancellation) ---
    d = x_ref[...].astype(jnp.float32) - mean
    var = jnp.sum(d * d, axis=-1, keepdims=True) * inv_nm1                 # (tb, 1)
    inv = 1.0 / (jnp.sqrt(var) + eps)  # eps added to std, matching the module

    # --- pass 3: normalize + per-channel affine in one fused elementwise sweep ---
    g = gamma_ref[...].astype(jnp.float32)                                 # (1, N)
    b = beta_ref[...].astype(jnp.float32)                                  # (1, N)
    xn = (x_ref[...].astype(jnp.float32) - mean) * inv
    o_ref[...] = (xn * g + b).astype(o_ref.dtype)


def _pick_tb(B, tb_cap):
    """Largest usable batch-tile size that divides B and is <= tb_cap."""
    tb_cap = max(1, int(tb_cap))
    if B <= tb_cap:
        return B  # full batch extent -> no sublane-tiling constraint at all
    best8, best = None, 1
    for d in range(1, min(B - 1, tb_cap) + 1):
        if B % d == 0:
            best = d
            if d % 8 == 0:
                best8 = d  # prefer clean sublane tiling
    return best8 if best8 is not None else best


def layer_norm(x, gamma, beta, eps=1e-5):
    """x: (B, C, H, W) NCHW.  gamma, beta: (C,).  Returns (B, C, H, W)."""
    B, C, H, W = x.shape
    HW = H * W
    N = C * HW
    itemsize = jnp.dtype(x.dtype).itemsize

    # Lane-dense layout: samples are rows, everything else is the lane axis.
    x2 = x.reshape(B, N)
    # Pre-broadcast per-channel affine params to the flattened layout (tiny arrays,
    # fetched once since their block index never changes).
    gamma2 = jnp.broadcast_to(jnp.reshape(gamma, (C, 1)), (C, HW)).reshape(1, N)
    beta2 = jnp.broadcast_to(jnp.reshape(beta, (C, 1)), (C, HW)).reshape(1, N)

    # --- VMEM budget from hardware (48 MiB on v7x, 96 MiB on v5e/v6e) ---
    try:
        vmem_cap = int(getattr(pltpu.get_tpu_info(), "vmem_capacity_bytes",
                               64 * 1024 * 1024))
    except Exception:
        vmem_cap = 64 * 1024 * 1024
    vmem_budget = min(int(0.75 * vmem_cap), 96 * 1024 * 1024)

    # Resident bytes per sample in a block: double-buffered input + output at the
    # native dtype (2 * 2 * itemsize) plus ~3 f32-sweep temporaries (3 * 4).
    resident_per_sample = N * (4 * itemsize + 12)
    tb_cap = max(1, vmem_budget // resident_per_sample)
    # TODO(synk): if a single sample's resident footprint exceeds the VMEM budget,
    # add an N-chunked reduction grid axis ("arbitrary") with s1/s2 scratch and a
    # pl.when finalize instead of keeping a whole sample resident.

    # When B allows, prefer >= 8 grid steps (pipelining + both v7x cores), but keep
    # each block >= ~1 MiB so DMAs stay near the HBM roofline.
    per_sample_bytes = N * itemsize
    min_block_bytes = 1 * 1024 * 1024
    target_steps = 8
    if B >= target_steps:
        tb_steps = max(1, B // target_steps)
        if tb_steps * per_sample_bytes >= min_block_bytes:
            tb_cap = min(tb_cap, tb_steps)

    tb = _pick_tb(B, tb_cap)
    grid = (B // tb,)  # tb divides B exactly: no padding, no post-slice

    kernel = functools.partial(_layernorm_kernel, eps=eps, n=N)

    out = pl.pallas_call(
        kernel,
        out_shape=jax.ShapeDtypeStruct((B, N), x.dtype),
        grid_spec=pltpu.PrefetchScalarGridSpec(
            num_scalar_prefetch=0,
            grid=grid,
            in_specs=[
                pl.BlockSpec((tb, N), lambda b: (b, 0)),
                pl.BlockSpec((1, N), lambda b: (0, 0)),
                pl.BlockSpec((1, N), lambda b: (0, 0)),
            ],
            out_specs=pl.BlockSpec((tb, N), lambda b: (b, 0)),
        ),
        compiler_params=pltpu.CompilerParams(
            dimension_semantics=("parallel",),
            vmem_limit_bytes=int(vmem_budget),
        ),
    )(x2, gamma2, beta2)

    return out.reshape(B, C, H, W)


if __name__ == "__main__":
    key = jax.random.PRNGKey(0)
    kx, kg = jax.random.split(key)

    B, C, H, W = 2, 4, 16, 16
    x = jax.random.normal(kx, (B, C, H, W), dtype=jnp.float32)

    # deterministic parameter init matching nn.Parameter(Tensor(C).uniform_()) / zeros(C)
    gamma = jax.random.uniform(kg, (C,), dtype=jnp.float32)
    beta = jnp.zeros((C,), dtype=jnp.float32)

    out = layer_norm(x, gamma, beta, eps=1e-5)
    out = jax.block_until_ready(out)

    # reference in plain JAX (per-sample mean / unbiased std, eps added to std,
    # per-channel affine) — matches the PyTorch module's forward for B >= 1
    xf = x.reshape(B, -1)
    n = xf.shape[1]
    mean = xf.mean(axis=1).reshape(B, 1, 1, 1)
    std = jnp.sqrt(((xf - xf.mean(axis=1, keepdims=True)) ** 2).sum(axis=1) / (n - 1)
                   ).reshape(B, 1, 1, 1)
    ref = (x - mean) / (std + 1e-5)
    ref = ref * gamma.reshape(1, C, 1, 1) + beta.reshape(1, C, 1, 1)

    assert jnp.allclose(out, ref, atol=1e-4, rtol=1e-4), "mismatch vs reference"
    print("KERNEL_OK")
</pallas_src>

<mosaic_0001>
module attributes {stable_mosaic.version = 11 : i64} {
  func.func @_layernorm_kernel(%arg0: i32, %arg1: memref<2x1024xf32, #tpu.memory_space<vmem>>, %arg2: memref<1x1024xf32, #tpu.memory_space<vmem>>, %arg3: memref<1x1024xf32, #tpu.memory_space<vmem>>, %arg4: memref<2x1024xf32, #tpu.memory_space<vmem>>) attributes {dimension_semantics = [#tpu.dimension_semantics<parallel>], iteration_bounds = array<i64: 1>, scalar_prefetch = 0 : i64, scratch_operands = 0 : i64, tpu.core_type = #tpu.core_type<tc>, window_params = [{transform_indices = @transform_0, window_bounds = array<i64: 2, 1024>}, {pipeline_mode = #tpu.pipeline_mode<synchronous>, transform_indices = @transform_1, window_bounds = array<i64: 1, 1024>}, {pipeline_mode = #tpu.pipeline_mode<synchronous>, transform_indices = @transform_2, window_bounds = array<i64: 1, 1024>}, {transform_indices = @transform_3, window_bounds = array<i64: 2, 1024>}]} {
    %c0 = arith.constant 0 : index
    %c0_0 = arith.constant 0 : index
    %0 = vector.load %arg1[%c0, %c0_0] : memref<2x1024xf32, #tpu.memory_space<vmem>>, vector<2x1024xf32>
    %cst = arith.constant dense<0.000000e+00> : vector<2xf32>
    %1 = vector.multi_reduction <add>, %0, %cst [1] : vector<2x1024xf32> to vector<2xf32>
    %2 = vector.shape_cast %1 : vector<2xf32> to vector<2x1xf32>
    %cst_1 = arith.constant 9.765625E-4 : f32
    %3 = vector.broadcast %cst_1 : f32 to vector<2x1xf32>
    %4 = arith.mulf %2, %3 : vector<2x1xf32>
    %c0_2 = arith.constant 0 : index
    %c0_3 = arith.constant 0 : index
    %5 = vector.load %arg1[%c0_2, %c0_3] : memref<2x1024xf32, #tpu.memory_space<vmem>>, vector<2x1024xf32>
    %6 = vector.broadcast %4 : vector<2x1xf32> to vector<2x1024xf32>
    %7 = arith.subf %5, %6 : vector<2x1024xf32>
    %8 = arith.mulf %7, %7 : vector<2x1024xf32>
    %cst_4 = arith.constant dense<0.000000e+00> : vector<2xf32>
    %9 = vector.multi_reduction <add>, %8, %cst_4 [1] : vector<2x1024xf32> to vector<2xf32>
    %10 = vector.shape_cast %9 : vector<2xf32> to vector<2x1xf32>
    %cst_5 = arith.constant 9.77517105E-4 : f32
    %11 = vector.broadcast %cst_5 : f32 to vector<2x1xf32>
    %12 = arith.mulf %10, %11 : vector<2x1xf32>
    %13 = math.sqrt %12 : vector<2x1xf32>
    %cst_6 = arith.constant 9.99999974E-6 : f32
    %14 = vector.broadcast %cst_6 : f32 to vector<2x1xf32>
    %15 = arith.addf %13, %14 : vector<2x1xf32>
    %cst_7 = arith.constant 1.000000e+00 : f32
    %16 = vector.broadcast %cst_7 : f32 to vector<2x1xf32>
    %17 = arith.divf %16, %15 : vector<2x1xf32>
    %c0_8 = arith.constant 0 : index
    %c0_9 = arith.constant 0 : index
    %18 = vector.load %arg2[%c0_8, %c0_9] : memref<1x1024xf32, #tpu.memory_space<vmem>>, vector<1x1024xf32>
    %c0_10 = arith.constant 0 : index
    %c0_11 = arith.constant 0 : index
    %19 = vector.load %arg3[%c0_10, %c0_11] : memref<1x1024xf32, #tpu.memory_space<vmem>>, vector<1x1024xf32>
    %c0_12 = arith.constant 0 : index
    %c0_13 = arith.constant 0 : index
    %20 = vector.load %arg1[%c0_12, %c0_13] : memref<2x1024xf32, #tpu.memory_space<vmem>>, vector<2x1024xf32>
    %21 = vector.broadcast %4 : vector<2x1xf32> to vector<2x1024xf32>
    %22 = arith.subf %20, %21 : vector<2x1024xf32>
    %23 = vector.broadcast %17 : vector<2x1xf32> to vector<2x1024xf32>
    %24 = arith.mulf %22, %23 : vector<2x1024xf32>
    %25 = vector.broadcast %18 : vector<1x1024xf32> to vector<2x1024xf32>
    %26 = arith.mulf %24, %25 : vector<2x1024xf32>
    %27 = vector.broadcast %19 : vector<1x1024xf32> to vector<2x1024xf32>
    %28 = arith.addf %26, %27 : vector<2x1024xf32>
    %c0_14 = arith.constant 0 : index
    %c0_15 = arith.constant 0 : index
    %29 = vector.load %arg4[%c0_14, %c0_15] : memref<2x1024xf32, #tpu.memory_space<vmem>>, vector<2x1024xf32>
    tpu.vector_store %arg4[%c0_14, %c0_15], %28 {strides = array<i32>} : memref<2x1024xf32, #tpu.memory_space<vmem>>, vector<2x1024xf32>,
    return
  }
  func.func @transform_0(%arg0: i32) -> (i32, i32) {
    %c0_i32 = arith.constant 0 : i32
    %c0_i32_0 = arith.constant 0 : i32
    return %arg0, %c0_i32 : i32, i32
  }
  func.func @transform_1(%arg0: i32) -> (i32, i32) {
    %c0_i32 = arith.constant 0 : i32
    %c0_i32_0 = arith.constant 0 : i32
    %c0_i32_1 = arith.constant 0 : i32
    return %c0_i32, %c0_i32_0 : i32, i32
  }
  func.func @transform_2(%arg0: i32) -> (i32, i32) {
    %c0_i32 = arith.constant 0 : i32
    %c0_i32_0 = arith.constant 0 : i32
    %c0_i32_1 = arith.constant 0 : i32
    return %c0_i32, %c0_i32_0 : i32, i32
  }
  func.func @transform_3(%arg0: i32) -> (i32, i32) {
    %c0_i32 = arith.constant 0 : i32
    %c0_i32_0 = arith.constant 0 : i32
    return %arg0, %c0_i32 : i32, i32
  }
}

</mosaic_0001>

<bundles_post_ra>
// kernel: tpu_custom_call.1
= control target key start
LH: loop header
LB: loop body
LE: loop exit
PB: predicated region body
PF: predicated region fallthrough
CT: control target
= control target key end

     0   :  { %8 = vsyncpa [#allocation3], 0  ;;  %s450_s0 = inlined_call_operand.hbm [shape: f32[2,1024], index: 0, kind: input, shape index: {}]   ;;  %s451_s1 = inlined_call_operand.hbm [shape: f32[1,1024], index: 1, kind: input, shape index: {}]   ;;  %s452_s2 = inlined_call_operand.hbm [shape: f32[1,1024], index: 2, kind: input, shape index: {}]   ;;  %s453_s3 = inlined_call_operand.hbm [shape: f32[2,1024], index: 3, kind: output, shape index: {}]  }
   0x1   :  { %9 = vsyncpa [#allocation6], 0  ;;  %s27_s14 = sshll.u32 %s451_s1, 4  ;;  %s28_s14 = int_to_ptr.hbm [resolvable:$true] %s27_s14 }
   0x2   :  { %10 = vsyncpa [#allocation4], 0  ;;  %s368_s15 = smov [#allocation5]   ;;  %s16_s19 = sshll.u32 %s450_s0, 4  ;;  %s17_s19 = int_to_ptr.hbm [resolvable:$true] %s16_s19 }
   0x3   :  { %s29_s16 = sshll.u32 %s368_s15, 4  ;;  %s369_s20 = smov [#allocation2]   ;;  %s30_s16 = int_to_ptr.vmem [resolvable:$true] %s29_s16 }
   0x4   :  { %32 = dma.hbm_to_vmem [thread:$0]  %s28_s14, 128, %s30_s16, [#allocation6]  }
   0x5   :  { %s18_s21 = sshll.u32 %s369_s20, 4  ;;  %s38_s24 = sshll.u32 %s452_s2, 4  ;;  %s19_s21 = int_to_ptr.vmem [resolvable:$true] %s18_s21  ;;  %s39_s24 = int_to_ptr.hbm [resolvable:$true] %s38_s24 }
   0x6   :  { %21 = dma.hbm_to_vmem [thread:$0]  %s17_s19, 256, %s19_s21, [#allocation3]  }
   0x7   :  { %s370_s1 = smov [#allocation7]  }
   0x8   :  { %s40_s25 = sshll.u32 %s370_s1, 4  ;;  %s41_s25 = int_to_ptr.vmem [resolvable:$true] %s40_s25 }
   0x9   :  { %43 = dma.hbm_to_vmem [thread:$0]  %s39_s24, 128, %s41_s25, [#allocation6]  }
   0xa   :  { %362 = dma.done.wait [#allocation3], 256  }
   0xb   :  { %363 = vsyncadd [#allocation3], 4294967040 }
   0xc   :  { %364 = dma.done.wait [#allocation6], 256  }
   0xd   :  { %365 = vsyncadd [#allocation6], 4294967040  ;;  %v56_v0 = vld [vmem:[#allocation2] sm:$0xff]  ;;  %v57_v1 = vld [vmem:[#allocation2 + $0x8] sm:$0xff]  ;;  %vm79_vm0 = vcmask 1041408   ;;  %vm201_vm3 = vcmask 1045508  }
   0xe   :  { %60 = vst [vmem:[#allocation1] ss:$4 sm:$0xff] %v56_v0  ;;  %v371_v25 = vmov 269488144   ;;  %vm203_vm7 = vcmask 1043456   ;;  %s372_s0 = smov [#allocation8]  }
   0xf   :  { %62 = vst [vmem:[#allocation1 + $0x20] ss:$4 sm:$0xff] %v57_v1  ;;  %v410_v26 = vunpack.c.l.s4 %v371_v25  ;;  %s244_s2 = sshll.u32 %s372_s0, 4  ;;  %s246_s28 = sshll.u32 %s453_s3, 4  ;;  %s245_s2 = int_to_ptr.vmem [resolvable:$true] %s244_s2  ;;  %s247_s28 = int_to_ptr.hbm [resolvable:$true] %s246_s28 }
  0x11   :  { %v101_v27 = vunpack.c.0.s8 %v410_v26 }
  0x15   :  { %v63_v2 = vld.sshfl [vmem:[#allocation1] sm:$0xff pattern:$0x73625140]  ;;  %v64_v3 = vld.sshfl [vmem:[#allocation1 + $0x8] sm:$0xff pattern:$0x73625140] }
  0x16   :  { %v65_v4 = vld.sshfl [vmem:[#allocation1 + $0x10] sm:$0xff pattern:$0x73625140]  ;;  %v66_v5 = vld.sshfl [vmem:[#allocation1 + $0x18] sm:$0xff pattern:$0x73625140] }
  0x17   :  { %v80_v6 = vsel %vm79_vm0, %v63_v2, 0.0  ;;  %v81_v7 = vsel %vm79_vm0, %v64_v3, 0.0  ;;  %v83_v8 = vsel %vm79_vm0, %v65_v4, 0.0  ;;  %v67_v9 = vld.sshfl [vmem:[#allocation1 + $0x20] sm:$0xff pattern:$0x73625140] }
  0x18   :  { %v82_v10 = vadd.f32 %v81_v7, %v80_v6  ;;  %v85_v11 = vsel %vm79_vm0, %v66_v5, 0.0  ;;  %v68_v12 = vld.sshfl [vmem:[#allocation1 + $0x28] sm:$0xff pattern:$0x73625140]  ;;  %v87_v14 = vsel %vm79_vm0, %v67_v9, 0.0  ;;  %v175_v7 = vld [vmem:[#allocation5] sm:$0xff] }
  0x19   :  { %v69_v15 = vld.sshfl [vmem:[#allocation1 + $0x30] sm:$0xff pattern:$0x73625140]  ;;  %v89_v17 = vsel %vm79_vm0, %v68_v12, 0.0  ;;  %v188_v9 = vperm.slane %v175_v7, 2  ;;  %v176_v12 = vld [vmem:[#allocation7] sm:$0xff] }
  0x1a   :  { %v84_v13 = vadd.f32 %v83_v8, %v82_v10  ;;  %v70_v18 = vld.sshfl [vmem:[#allocation1 + $0x38] sm:$0xff pattern:$0x73625140]  ;;  %v91_v20 = vsel %vm79_vm0, %v69_v15, 0.0  ;;  %v187_v8 = vperm.slane %v175_v7, 1  ;;  %v189_v10 = vperm.slane %v175_v7, 3 }
  0x1b   :  { %v93_v22 = vsel %vm79_vm0, %v70_v18, 0.0  ;;  %v186_v15 = vperm.slane %v175_v7, 0  ;;  %v216_v25 = vperm.slane %v176_v12, 3 }
  0x1c   :  { %v86_v16 = vadd.f32 %v85_v11, %v84_v13  ;;  %v191_v11 = vperm.slane %v175_v7, 5  ;;  %v192_v13 = vperm.slane %v175_v7, 6  ;;  %v194_v18 = vrot.slane %v187_v8, 6 }
  0x1e   :  { %v88_v19 = vadd.f32 %v87_v14, %v86_v16  ;;  %v190_v16 = vperm.slane %v175_v7, 4 }
  0x20   :  { %v90_v21 = vadd.f32 %v89_v17, %v88_v19  ;;  %v193_v17 = vperm.slane %v175_v7, 7 }
  0x22   :  { %v92_v23 = vadd.f32 %v91_v20, %v90_v21  ;;  %v195_v20 = vrot.slane %v188_v9, 4  ;;  %v196_v21 = vrot.slane %v189_v10, 2 }
  0x24   :  { %v94_v24 = vadd.f32 %v93_v22, %v92_v23  ;;  %v197_v22 = vrot.slane %v191_v11, 6  ;;  %v214_v23 = vperm.slane %v176_v12, 1 }
  0x26   :  { %95 = vadd.xlane.f32.xlu0 %v94_v24  ;;  %v215_v24 = vperm.slane %v176_v12, 2 }
  0x99   :  { %v96_v28 = vpop.xlane.xlu0 %95 }
  0x9a   :  { %v97_v29 = vmul.f32 0.0009765625, %v96_v28  ;;  %v218_v28 = vperm.slane %v176_v12, 5 }
  0x9c   :  { %v102_v30 = vperm.slane %v97_v29, %v101_v27 }
  0x9e   :  { %v415_v31 = vsub.f32 %v56_v0, %v102_v30  ;;  %v417_v32 = vsub.f32 %v57_v1, %v102_v30  ;;  %v198_v30 = vrot.slane %v192_v13, 4 }
  0xa0   :  { %v106_v33 = vmul.f32 %v415_v31, %v415_v31  ;;  %v107_v34 = vmul.f32 %v417_v32, %v417_v32 }
  0xa2   :  { %110 = vst [vmem:[#allocation1] ss:$4 sm:$0xff] %v106_v33  ;;  %v219_v33 = vperm.slane %v176_v12, 6 }
  0xa3   :  { %112 = vst [vmem:[#allocation1 + $0x20] ss:$4 sm:$0xff] %v107_v34  ;;  %v220_v34 = vperm.slane %v176_v12, 7 }
  0xa9   :  { %v113_v35 = vld.sshfl [vmem:[#allocation1] sm:$0xff pattern:$0x73625140]  ;;  %v114_v36 = vld.sshfl [vmem:[#allocation1 + $0x8] sm:$0xff pattern:$0x73625140] }
  0xaa   :  { %v115_v37 = vld.sshfl [vmem:[#allocation1 + $0x10] sm:$0xff pattern:$0x73625140]  ;;  %v129_v38 = vsel %vm79_vm0, %v113_v35, 0.0  ;;  %v130_v39 = vsel %vm79_vm0, %v114_v36, 0.0  ;;  %v199_v36 = vrot.slane %v193_v17, 2 }
  0xab   :  { %v116_v40 = vld.sshfl [vmem:[#allocation1 + $0x18] sm:$0xff pattern:$0x73625140]  ;;  %v131_v41 = vadd.f32 %v130_v39, %v129_v38  ;;  %v132_v42 = vsel %vm79_vm0, %v115_v37, 0.0  ;;  %v213_v37 = vperm.slane %v176_v12, 0 }
  0xac   :  { %v117_v43 = vld.sshfl [vmem:[#allocation1 + $0x20] sm:$0xff pattern:$0x73625140]  ;;  %v134_v45 = vsel %vm79_vm0, %v116_v40, 0.0  ;;  %v217_v40 = vperm.slane %v176_v12, 4 }
  0xad   :  { %v133_v44 = vadd.f32 %v132_v42, %v131_v41  ;;  %v118_v46 = vld.sshfl [vmem:[#allocation1 + $0x28] sm:$0xff pattern:$0x73625140]  ;;  %v136_v48 = vsel %vm79_vm0, %v117_v43, 0.0  ;;  %v221_v41 = vrot.slane %v214_v23, 6  ;;  %v222_v42 = vrot.slane %v215_v24, 4 }
  0xae   :  { %v119_v49 = vld.sshfl [vmem:[#allocation1 + $0x30] sm:$0xff pattern:$0x73625140]  ;;  %v138_v51 = vsel %vm79_vm0, %v118_v46, 0.0  ;;  %v223_v43 = vrot.slane %v216_v25, 2  ;;  %v225_v46 = vrot.slane %v219_v33, 4 }
  0xaf   :  { %v135_v47 = vadd.f32 %v134_v45, %v133_v44  ;;  %v120_v52 = vld.sshfl [vmem:[#allocation1 + $0x38] sm:$0xff pattern:$0x73625140]  ;;  %v140_v54 = vsel %vm79_vm0, %v119_v49, 0.0  ;;  %v224_v44 = vrot.slane %v218_v28, 6  ;;  %v200_v49 = vsel %vm79_vm0, %v186_v15, %v194_v18 }
  0xb0   :  { %v142_v56 = vsel %vm79_vm0, %v120_v52, 0.0  ;;  %v205_v52 = vsel %vm79_vm0, %v190_v16, %v197_v22 }
  0xb1   :  { %v137_v50 = vadd.f32 %v136_v48, %v135_v47  ;;  %v226_v47 = vrot.slane %v220_v34, 2 }
  0xb3   :  { %v139_v53 = vadd.f32 %v138_v51, %v137_v50  ;;  %v202_v50 = vsel %vm201_vm3, %v195_v20, %v196_v21 }
  0xb5   :  { %v141_v55 = vadd.f32 %v140_v54, %v139_v53  ;;  %v206_v53 = vsel %vm201_vm3, %v198_v30, %v199_v36 }
  0xb7   :  { %v143_v57 = vadd.f32 %v142_v56, %v141_v55  ;;  %v227_v55 = vsel %vm79_vm0, %v213_v37, %v221_v41 }
  0xb9   :  { %144 = vadd.xlane.f32.xlu0 %v143_v57  ;;  %v228_v57 = vsel %vm201_vm3, %v222_v42, %v223_v43 }
 0x12c   :  { %v145_v58 = vpop.xlane.xlu0 %144 }
 0x12d   :  { %v146_v59 = vmul.f32 0.0009775171, %v145_v58  ;;  %v230_v58 = vsel %vm79_vm0, %v217_v40, %v224_v44 }
 0x12f   :  { %262 = vrsqrt.f32 %v146_v59  ;;  %vm154_vm1 = vcmp.eq.f32.partialorder %v146_v59, inf  ;;  %v157_v3 = vand.u32 2147483648, %v146_v59  ;;  %vm156_vm2 = vcmp.eq.f32.partialorder %v146_v59, 0.0 }
 0x135   :  { %v263_v60 = vpop.eup %262 }
 0x136   :  { %v148_v61 = vmul.f32 %v263_v60, %v146_v59 }
 0x138   :  { %v149_v62 = vmul.f32 %v263_v60, %v148_v61  ;;  %v207_v61 = vsel %vm203_vm7, %v205_v52, %v206_v53 }
 0x13a   :  { %v150_v63 = vmul.f32 0.5, %v149_v62 }
 0x13c   :  { %v151_v0 = vsub.f32 1.5, %v150_v63 }
 0x13e   :  { %v152_v1 = vmul.f32 %v263_v60, %v151_v0  ;;  %v204_v60 = vsel %vm203_vm7, %v200_v49, %v202_v50  ;;  %v229_v0 = vsel %vm203_vm7, %v227_v55, %v228_v57 }
 0x140   :  { %v153_v2 = vmul.f32 %v152_v1, %v146_v59 }
 0x142   :  { %v155_v4 = vsel %vm154_vm1, %v146_v59, %v153_v2  ;;  %v231_v59 = vsel %vm201_vm3, %v225_v46, %v226_v47 }
 0x143   :  { %v158_v5 = vsel %vm156_vm2, %v157_v3, %v155_v4  ;;  %v232_v1 = vsel %vm203_vm7, %v230_v58, %v231_v59 }
 0x144   :  { %v159_v6 = vadd.f32 1e-05, %v158_v5 }
 0x146   :  { %264 = vrcp.f32 %v159_v6  ;;  %v171_v35 = vand.u32 2147483648, %v159_v6  ;;  %v169_v39 = vand.u32 2147483647, %v159_v6  ;;  %vm165_vm5 = vweird.f32 %v159_v6 }
 0x148   :  { %v172_v48 = vor.u32 1.1754944e-38, %v171_v35  ;;  %vm170_vm8 = vcmp.eq.f32.partialorder %v169_v39, 8.507059e+37 }
 0x14c   :  { %v265_v14 = vpop.eup %264 }
 0x14d   :  { %v161_v19 = vmul.f32 %v265_v14, %v159_v6  ;;  %vm166_vm4 = vweird.f32 %v265_v14 }
 0x14e   :  { %vm167_vm6 = vmor %vm165_vm5, %vm166_vm4 }
 0x14f   :  { %v162_v29 = vsub.f32 1.0, %v161_v19 }
 0x151   :  { %v163_v38 = vmul.f32 %v265_v14, %v162_v29 }
 0x153   :  { %v164_v45 = vadd.f32 %v265_v14, %v163_v38 }
 0x155   :  { %v168_v51 = vsel %vm167_vm6, %v265_v14, %v164_v45 }
 0x156   :  { %v173_v54 = vsel %vm170_vm8, %v172_v48, %v168_v51 }
 0x157   :  { %v181_v56 = vperm.slane %v173_v54, %v101_v27 }
 0x159   :  { %v183_v62 = vmul.f32 %v181_v56, %v415_v31  ;;  %v184_v63 = vmul.f32 %v181_v56, %v417_v32 }
 0x15b   :  { %v210_v26 = vmul.f32 %v204_v60, %v183_v62  ;;  %v211_v27 = vmul.f32 %v207_v61, %v184_v63 }
 0x15d   :  { %v235_v2 = vadd.f32 %v229_v0, %v210_v26  ;;  %v236_v3 = vadd.f32 %v232_v1, %v211_v27 }
 0x15f   :  { %237 = vst [vmem:[#allocation8] sm:$0xff] %v235_v2 }
 0x160   :  { %238 = vst [vmem:[#allocation8 + $0x8] sm:$0xff] %v236_v3 }
 0x161   :  { %249 = dma.vmem_to_hbm [thread:$0]  %s245_s2, 256, %s247_s28, [#allocation4]  }
 0x162   :  { %366 = dma.done.wait [#allocation4], 256  }
 0x163   :  { %367 = vsyncadd [#allocation4], 4294967040 }
 0x164   :  { %254 = vsyncpa [#allocation3], 1 }
 0x165   :  { %255 = vsyncpa [#allocation6], 1 }
 0x166   :  { %256 = vsyncpa [#allocation4], 1 }

</bundles_post_ra>
